<compile_context>
chip_gen: v5e
topology: v5e:2x2
jax: 0.10.0
libtpu: 0.0.40
codegen_flags: <defaults>
</compile_context>

<pallas_src>
import functools

import jax
import jax.numpy as jnp
from jax import lax
from jax.experimental import pallas as pl
from jax.experimental.pallas import tpu as pltpu


_MIB = 1024 * 1024


def _tpu_vmem_plan():
    """Return (per-input-buffer budget bytes, vmem_limit_bytes or None) per TPU gen."""
    kind = ""
    try:
        kind = jax.devices()[0].device_kind.lower()
    except Exception:  # defensive: fall through to the conservative plan
        pass
    if "v7" in kind or "tpu7" in kind:
        # v7x: 64 MiB physical VMEM per TensorCore -> modest tiles + headroom.
        return 7 * _MIB, 44 * _MIB
    if "v6" in kind or "v5e" in kind or "v5 lite" in kind or "v5lite" in kind:
        # v5e / v6e: 128 MiB physical VMEM -> big double-buffered tiles.
        return 14 * _MIB, 96 * _MIB
    # Unknown / older generation: stay conservative under the default scoped limit.
    return 3 * _MIB, None


def _pick_batch_tile(B, D, itemsize, budget):
    """Largest lane-dense (multiple-of-128) batch tile within the VMEM budget.

    Multiples of 128 also satisfy every dtype's sublane packing (8 rows/vreg
    f32, 16 bf16, 32 int8/fp8).  Prefers a tile that divides B so the wrapper
    never has to pad/copy the inputs.
    """
    b_cap = max(128, ((B + 127) // 128) * 128)
    candidates = [t for t in (8192, 4096, 2048, 1024, 512, 256, 128)
                  if t <= b_cap and t * D * itemsize <= budget]
    if not candidates:
        # TODO(synk): for very large D, add a D grid axis with per-row
        # accumulators instead of one oversized (128, D) block.
        return 128
    for t in candidates:          # prefer a no-padding tile
        if B % t == 0:
            return t
    return candidates[0]


def _nce_sim_kernel(x1_ref, x2_ref, z_ref, *, inv_temp):
    # (tb, D) tiles arrive in stored dtype; upcast to f32 only in vregs.
    x1 = x1_ref[...].astype(jnp.float32)
    x2 = x2_ref[...].astype(jnp.float32)

    # F.normalize eps clamp: max(||x||, 1e-12) == sqrt(max(||x||^2, 1e-24)).
    eps2 = jnp.float32(1e-24)
    # Row reductions over D.  (For bf16 inputs on v7x -- VALU-bound regime --
    # these could be offloaded to the idle MXU via
    # jnp.dot(prod, jnp.ones((D, 1), f32), preferred_element_type=f32).)
    dot = jnp.sum(x1 * x2, axis=1)[None, :]   # (1, tb) lane-dense
    ss1 = jnp.sum(x1 * x1, axis=1)[None, :]
    ss2 = jnp.sum(x2 * x2, axis=1)[None, :]
    sim = dot * lax.rsqrt(jnp.maximum(ss1, eps2)) * lax.rsqrt(jnp.maximum(ss2, eps2))

    # z = sim / temp, written as an unmasked lane-dense (1, tb) row.
    z_ref[...] = sim * jnp.float32(inv_temp)


def nce_loss(input1, input2, temp=0.001):
    assert input1.shape == input2.shape and input1.ndim == 2
    B, D = input1.shape
    itemsize = jnp.dtype(input1.dtype).itemsize

    budget, vmem_limit = _tpu_vmem_plan()
    tb = _pick_batch_tile(B, D, itemsize, budget)

    # Pad B up to a tile multiple (zero rows give sim = 0 and are sliced off
    # before the softmax), so there is never an un-pipelined full-array block.
    B_pad = ((B + tb - 1) // tb) * tb
    if B_pad != B:
        pad = ((0, B_pad - B), (0, 0))
        input1 = jnp.pad(input1, pad)
        input2 = jnp.pad(input2, pad)

    # Explicit scoped-VMEM limit: 2 inputs x 2 pipeline buffers + output + slack.
    needed = 4 * tb * D * itemsize + 2 * _MIB
    if vmem_limit is not None:
        vmem_limit = max(vmem_limit, needed)
    elif needed > 12 * _MIB:
        vmem_limit = needed

    cp_kwargs = dict(dimension_semantics=("parallel",))
    if vmem_limit is not None:
        cp_kwargs["vmem_limit_bytes"] = int(vmem_limit)

    kernel = functools.partial(_nce_sim_kernel, inv_temp=1.0 / temp)

    z = pl.pallas_call(
        kernel,
        out_shape=jax.ShapeDtypeStruct((1, B_pad), jnp.float32),
        grid_spec=pltpu.PrefetchScalarGridSpec(
            num_scalar_prefetch=0,
            grid=(B_pad // tb,),
            in_specs=[
                pl.BlockSpec((tb, D), lambda i: (i, 0)),
                pl.BlockSpec((tb, D), lambda i: (i, 0)),
            ],
            out_specs=pl.BlockSpec((1, tb), lambda i: (0, i)),
        ),
        compiler_params=pltpu.CompilerParams(**cp_kwargs),
    )(input1, input2)

    # O(B) epilogue in plain XLA (keeps the kernel's batch axis "parallel").
    logpt = jax.nn.log_softmax(z[0, :B], axis=-1)       # (B,)
    neg_logpt = -logpt

    # torch.diag(1-D logpt) -> (B, B) diagonal matrix, matching the PyTorch
    # forward exactly.  If a downstream consumer just reduces the loss
    # (sum/mean), return `neg_logpt` directly instead of materializing
    # B^2 * 4 bytes of HBM.
    return jnp.diag(neg_logpt)


def _nce_loss_ref(input1, input2, temp=0.001):
    # Pure-JAX reference mirroring the PyTorch forward exactly.
    eps = 1e-12
    n1 = input1 / jnp.maximum(jnp.linalg.norm(input1, axis=1, keepdims=True), eps)
    n2 = input2 / jnp.maximum(jnp.linalg.norm(input2, axis=1, keepdims=True), eps)
    sim = jnp.sum(n1 * n2, axis=1)                    # (B,)
    logpt = jax.nn.log_softmax(sim / temp, axis=-1)   # (B,)
    return -jnp.diag(logpt)                           # (B, B)


if __name__ == "__main__":
    key = jax.random.PRNGKey(0)
    k1, k2 = jax.random.split(key)
    B, D = 8, 32
    x1 = jax.random.normal(k1, (B, D), dtype=jnp.float32)
    x2 = jax.random.normal(k2, (B, D), dtype=jnp.float32)

    out = nce_loss(x1, x2, temp=0.001)
    out = jax.block_until_ready(out)

    ref = _nce_loss_ref(x1, x2, temp=0.001)
    assert out.shape == (B, B)
    assert jnp.allclose(out, ref, atol=1e-3, rtol=1e-3), (out, ref)

    print("KERNEL_OK")
</pallas_src>

<mosaic_0001>
module attributes {stable_mosaic.version = 11 : i64} {
  func.func @_nce_sim_kernel(%arg0: i32, %arg1: memref<128x32xf32, #tpu.memory_space<vmem>>, %arg2: memref<128x32xf32, #tpu.memory_space<vmem>>, %arg3: memref<1x128xf32, #tpu.memory_space<vmem>>) attributes {dimension_semantics = [#tpu.dimension_semantics<parallel>], iteration_bounds = array<i64: 1>, scalar_prefetch = 0 : i64, scratch_operands = 0 : i64, tpu.core_type = #tpu.core_type<tc>, window_params = [{transform_indices = @transform_0, window_bounds = array<i64: 128, 32>}, {transform_indices = @transform_1, window_bounds = array<i64: 128, 32>}, {transform_indices = @transform_2, window_bounds = array<i64: 1, 128>}]} {
    %c0 = arith.constant 0 : index
    %c0_0 = arith.constant 0 : index
    %0 = vector.load %arg1[%c0, %c0_0] : memref<128x32xf32, #tpu.memory_space<vmem>>, vector<128x32xf32>
    %c0_1 = arith.constant 0 : index
    %c0_2 = arith.constant 0 : index
    %1 = vector.load %arg2[%c0_1, %c0_2] : memref<128x32xf32, #tpu.memory_space<vmem>>, vector<128x32xf32>
    %2 = arith.mulf %0, %1 : vector<128x32xf32>
    %cst = arith.constant dense<0.000000e+00> : vector<128xf32>
    %3 = vector.multi_reduction <add>, %2, %cst [1] : vector<128x32xf32> to vector<128xf32>
    %4 = vector.shape_cast %3 : vector<128xf32> to vector<1x128xf32>
    %5 = arith.mulf %0, %0 : vector<128x32xf32>
    %cst_3 = arith.constant dense<0.000000e+00> : vector<128xf32>
    %6 = vector.multi_reduction <add>, %5, %cst_3 [1] : vector<128x32xf32> to vector<128xf32>
    %7 = vector.shape_cast %6 : vector<128xf32> to vector<1x128xf32>
    %8 = arith.mulf %1, %1 : vector<128x32xf32>
    %cst_4 = arith.constant dense<0.000000e+00> : vector<128xf32>
    %9 = vector.multi_reduction <add>, %8, %cst_4 [1] : vector<128x32xf32> to vector<128xf32>
    %10 = vector.shape_cast %9 : vector<128xf32> to vector<1x128xf32>
    %cst_5 = arith.constant 1.000000e-24 : f32
    %11 = vector.broadcast %cst_5 : f32 to vector<1x128xf32>
    %12 = arith.maximumf %7, %11 : vector<1x128xf32>
    %13 = math.rsqrt %12 : vector<1x128xf32>
    %14 = arith.mulf %4, %13 : vector<1x128xf32>
    %cst_6 = arith.constant 1.000000e-24 : f32
    %15 = vector.broadcast %cst_6 : f32 to vector<1x128xf32>
    %16 = arith.maximumf %10, %15 : vector<1x128xf32>
    %17 = math.rsqrt %16 : vector<1x128xf32>
    %18 = arith.mulf %14, %17 : vector<1x128xf32>
    %cst_7 = arith.constant 1.000000e+03 : f32
    %19 = vector.broadcast %cst_7 : f32 to vector<1x128xf32>
    %20 = arith.mulf %18, %19 : vector<1x128xf32>
    %c0_8 = arith.constant 0 : index
    %c0_9 = arith.constant 0 : index
    %21 = vector.load %arg3[%c0_8, %c0_9] : memref<1x128xf32, #tpu.memory_space<vmem>>, vector<1x128xf32>
    tpu.vector_store %arg3[%c0_8, %c0_9], %20 {strides = array<i32>} : memref<1x128xf32, #tpu.memory_space<vmem>>, vector<1x128xf32>,
    return
  }
  func.func @transform_0(%arg0: i32) -> (i32, i32) {
    %c0_i32 = arith.constant 0 : i32
    %c0_i32_0 = arith.constant 0 : i32
    return %arg0, %c0_i32 : i32, i32
  }
  func.func @transform_1(%arg0: i32) -> (i32, i32) {
    %c0_i32 = arith.constant 0 : i32
    %c0_i32_0 = arith.constant 0 : i32
    return %arg0, %c0_i32 : i32, i32
  }
  func.func @transform_2(%arg0: i32) -> (i32, i32) {
    %c0_i32 = arith.constant 0 : i32
    %c0_i32_0 = arith.constant 0 : i32
    return %c0_i32, %arg0 : i32, i32
  }
}

</mosaic_0001>

<bundles_post_ra>
// kernel: tpu_custom_call.1
= control target key start
LH: loop header
LB: loop body
LE: loop exit
PB: predicated region body
PF: predicated region fallthrough
CT: control target
= control target key end

     0   :  { %vm60_vm0 = vcmask 261120   ;;  %s1768_s0 = inlined_call_operand.vmem [shape: f32[128,32], index: 0, kind: input, shape index: {}]   ;;  %s1769_s1 = inlined_call_operand.vmem [shape: f32[128,32], index: 1, kind: input, shape index: {}]   ;;  %s1770_s2 = inlined_call_operand.hbm [shape: f32[1,128], index: 2, kind: output, shape index: {}]  }
   0x1   :  { %v844_v0 = vld [vmem:[%s1768_s0 + $0x20] sm:$0xff]  ;;  %v854_v2 = vld [vmem:[%s1768_s0 + $0x10] sm:$0xff]  ;;  %v880_v9 = vld [vmem:[%s1768_s0 + $0x28] sm:$0xff] }
   0x2   :  { %v849_v1 = vld [vmem:[%s1769_s1 + $0x20] sm:$0xff]  ;;  %v861_v4 = vld [vmem:[%s1769_s1 + $0x10] sm:$0xff]  ;;  %v885_v10 = vld [vmem:[%s1769_s1 + $0x28] sm:$0xff] }
   0x3   :  { %v48_v3 = vmul.f32 %v849_v1, %v844_v0  ;;  %v866_v5 = vld [vmem:[%s1768_s0] sm:$0xff]  ;;  %v46_v7 = vmul.f32 %v861_v4, %v854_v2  ;;  %v890_v11 = vld [vmem:[%s1768_s0 + $0x18] sm:$0xff]  ;;  %v901_v14 = vld [vmem:[%s1768_s0 + $0x8] sm:$0xff]  ;;  %v49_v18 = vmul.f32 %v885_v10, %v880_v9 }
   0x4   :  { %v871_v6 = vld [vmem:[%s1769_s1] sm:$0xff]  ;;  %v896_v13 = vld [vmem:[%s1769_s1 + $0x18] sm:$0xff]  ;;  %v906_v15 = vld [vmem:[%s1769_s1 + $0x8] sm:$0xff] }
   0x5   :  { %v44_v8 = vmul.f32 %v871_v6, %v866_v5  ;;  %v73_v12 = vsel %vm60_vm0, %v48_v3, 0.0  ;;  %v67_v16 = vsel %vm60_vm0, %v46_v7, 0.0  ;;  %v47_v19 = vmul.f32 %v896_v13, %v890_v11  ;;  %v920_v22 = vld [vmem:[%s1768_s0 + $0x40] sm:$0xff]  ;;  %v932_v26 = vld [vmem:[%s1768_s0 + $0x38] sm:$0xff] }
   0x6   :  { %74 = vadd.xlane.f32.xlu2 %v73_v12  ;;  %68 = vadd.xlane.f32.xlu1 %v67_v16  ;;  %v45_v20 = vmul.f32 %v906_v15, %v901_v14  ;;  %v76_v21 = vsel %vm60_vm0, %v49_v18, 0.0  ;;  %v927_v25 = vld [vmem:[%s1769_s1 + $0x40] sm:$0xff] }
   0x7   :  { %v61_v17 = vsel %vm60_vm0, %v44_v8, 0.0  ;;  %v70_v23 = vsel %vm60_vm0, %v47_v19, 0.0 }
   0x8   :  { %62 = vadd.xlane.f32.xlu0 %v61_v17  ;;  %v64_v24 = vsel %vm60_vm0, %v45_v20, 0.0 }
   0x9   :  { %7 = vsyncpa [#allocation3], 0  ;;  %v937_v27 = vld [vmem:[%s1769_s1 + $0x38] sm:$0xff]  ;;  %v942_v28 = vld [vmem:[%s1768_s0 + $0x30] sm:$0xff]  ;;  %v52_v30 = vmul.f32 %v927_v25, %v920_v22  ;;  %v110_v62 = vmul.f32 %v901_v14, %v901_v14  ;;  %v109_v63 = vmul.f32 %v866_v5, %v866_v5  ;;  %v113_v16 = vmul.f32 %v844_v0, %v844_v0  ;;  %s725_s19 = sshll.u32 %s1770_s2, 4  ;;  %s726_s19 = int_to_ptr.hbm [resolvable:$true] %s725_s19 }
   0xa   :  { %v947_v29 = vld [vmem:[%s1769_s1 + $0x30] sm:$0xff]  ;;  %v51_v31 = vmul.f32 %v937_v27, %v932_v26  ;;  %v961_v36 = vld [vmem:[%s1768_s0 + $0x58] sm:$0xff]  ;;  %v981_v40 = vld [vmem:[%s1768_s0 + $0x48] sm:$0xff]  ;;  %v112_v14 = vmul.f32 %v890_v11, %v890_v11  ;;  %v111_v5 = vmul.f32 %v854_v2, %v854_v2  ;;  %v175_v20 = vmul.f32 %v861_v4, %v861_v4 }
   0xb   :  { %v50_v32 = vmul.f32 %v947_v29, %v942_v28  ;;  %v85_v33 = vsel %vm60_vm0, %v52_v30, 0.0  ;;  %v966_v37 = vld [vmem:[%s1769_s1 + $0x58] sm:$0xff]  ;;  %v971_v38 = vld [vmem:[%s1768_s0 + $0x50] sm:$0xff]  ;;  %v986_v41 = vld [vmem:[%s1769_s1 + $0x48] sm:$0xff]  ;;  %v128_v7 = vsel %vm60_vm0, %v110_v62, 0.0  ;;  %v125_v8 = vsel %vm60_vm0, %v109_v63, 0.0 }
   0xc   :  { %v82_v34 = vsel %vm60_vm0, %v51_v31, 0.0  ;;  %v976_v39 = vld [vmem:[%s1769_s1 + $0x50] sm:$0xff]  ;;  %v55_v42 = vmul.f32 %v966_v37, %v961_v36  ;;  %v53_v44 = vmul.f32 %v986_v41, %v981_v40  ;;  %v1010_v50 = vld [vmem:[%s1768_s0 + $0x68] sm:$0xff]  ;;  %v1020_v52 = vld [vmem:[%s1768_s0 + $0x60] sm:$0xff]  ;;  %v137_v17 = vsel %vm60_vm0, %v113_v16, 0.0 }
   0xd   :  { %v79_v35 = vsel %vm60_vm0, %v50_v32, 0.0  ;;  %v54_v43 = vmul.f32 %v976_v39, %v971_v38  ;;  %v1000_v48 = vld [vmem:[%s1768_s0 + $0x70] sm:$0xff]  ;;  %v1015_v51 = vld [vmem:[%s1769_s1 + $0x68] sm:$0xff]  ;;  %v1025_v53 = vld [vmem:[%s1769_s1 + $0x60] sm:$0xff]  ;;  %v134_v18 = vsel %vm60_vm0, %v112_v14, 0.0  ;;  %v131_v19 = vsel %vm60_vm0, %v111_v5, 0.0 }
   0xe   :  { %77 = vadd.xlane.f32.xlu2 %v76_v21  ;;  %71 = vadd.xlane.f32.xlu1 %v70_v23  ;;  %v94_v45 = vsel %vm60_vm0, %v55_v42, 0.0  ;;  %v88_v47 = vsel %vm60_vm0, %v53_v44, 0.0  ;;  %v1005_v49 = vld [vmem:[%s1769_s1 + $0x70] sm:$0xff]  ;;  %v57_v55 = vmul.f32 %v1015_v51, %v1010_v50  ;;  %v56_v56 = vmul.f32 %v1025_v53, %v1020_v52  ;;  %v1039_v60 = vld [vmem:[%s1768_s0 + $0x78] sm:$0xff]  ;;  %s825_s0 = smov [#allocation2]  }
   0xf   :  { %v91_v46 = vsel %vm60_vm0, %v54_v43, 0.0  ;;  %v58_v54 = vmul.f32 %v1005_v49, %v1000_v48  ;;  %v1044_v61 = vld [vmem:[%s1769_s1 + $0x78] sm:$0xff]  ;;  %v174_v0 = vmul.f32 %v906_v15, %v906_v15  ;;  %v173_v11 = vmul.f32 %v871_v6, %v871_v6  ;;  %s723_s1 = sshll.u32 %s825_s0, 4  ;;  %s724_s1 = int_to_ptr.vmem [resolvable:$true] %s723_s1 }
  0x10   :  { %65 = vadd.xlane.f32.xlu0 %v64_v24  ;;  %v100_v58 = vsel %vm60_vm0, %v57_v55, 0.0  ;;  %v97_v59 = vsel %vm60_vm0, %v56_v56, 0.0  ;;  %v59_v3 = vmul.f32 %v1044_v61, %v1039_v60  ;;  %v195_v2 = vsel %vm60_vm0, %v175_v20, 0.0 }
  0x11   :  { %v103_v57 = vsel %vm60_vm0, %v58_v54, 0.0  ;;  %v192_v21 = vsel %vm60_vm0, %v174_v0, 0.0  ;;  %v189_v23 = vsel %vm60_vm0, %v173_v11, 0.0  ;;  %v115_v24 = vmul.f32 %v942_v28, %v942_v28 }
  0x12   :  { %v106_v12 = vsel %vm60_vm0, %v59_v3, 0.0  ;;  %v176_v4 = vmul.f32 %v896_v13, %v896_v13  ;;  %v114_v15 = vmul.f32 %v880_v9, %v880_v9  ;;  %v178_v32 = vmul.f32 %v885_v10, %v885_v10 }
  0x13   :  { %v143_v6 = vsel %vm60_vm0, %v115_v24, 0.0  ;;  %v116_v28 = vmul.f32 %v932_v26, %v932_v26  ;;  %v177_v13 = vmul.f32 %v849_v1, %v849_v1  ;;  %v179_v10 = vmul.f32 %v947_v29, %v947_v29 }
  0x14   :  { %v198_v30 = vsel %vm60_vm0, %v176_v4, 0.0  ;;  %v140_v31 = vsel %vm60_vm0, %v114_v15, 0.0  ;;  %v204_v9 = vsel %vm60_vm0, %v178_v32, 0.0  ;;  %v117_v26 = vmul.f32 %v920_v22, %v920_v22 }
  0x15   :  { %v207_v42 = vsel %vm60_vm0, %v179_v10, 0.0  ;;  %v181_v44 = vmul.f32 %v927_v25, %v927_v25  ;;  %v180_v29 = vmul.f32 %v937_v27, %v937_v27  ;;  %v182_v25 = vmul.f32 %v986_v41, %v986_v41 }
  0x16   :  { %86 = vadd.xlane.f32.xlu2 %v85_v33  ;;  %83 = vadd.xlane.f32.xlu1 %v82_v34  ;;  %v146_v33 = vsel %vm60_vm0, %v116_v28, 0.0  ;;  %v201_v34 = vsel %vm60_vm0, %v177_v13, 0.0  ;;  %v149_v43 = vsel %vm60_vm0, %v117_v26, 0.0  ;;  %v184_v56 = vmul.f32 %v966_v37, %v966_v37 }
  0x17   :  { %v213_v22 = vsel %vm60_vm0, %v181_v44, 0.0  ;;  %v216_v54 = vsel %vm60_vm0, %v182_v25, 0.0  ;;  %v183_v41 = vmul.f32 %v976_v39, %v976_v39  ;;  %v185_v37 = vmul.f32 %v1025_v53, %v1025_v53 }
  0x18   :  { %80 = vadd.xlane.f32.xlu0 %v79_v35  ;;  %v118_v35 = vmul.f32 %v981_v40, %v981_v40  ;;  %v119_v40 = vmul.f32 %v971_v38, %v971_v38  ;;  %v120_v38 = vmul.f32 %v961_v36, %v961_v36  ;;  %v222_v36 = vsel %vm60_vm0, %v184_v56, 0.0 }
  0x19   :  { %v225_v62 = vsel %vm60_vm0, %v185_v37, 0.0  ;;  %v188_v3 = vmul.f32 %v1044_v61, %v1044_v61  ;;  %v186_v53 = vmul.f32 %v1015_v51, %v1015_v51 }
  0x1a   :  { %v152_v1 = vsel %vm60_vm0, %v118_v35, 0.0  ;;  %v158_v55 = vsel %vm60_vm0, %v120_v38, 0.0 }
  0x1b   :  { %v228_v14 = vsel %vm60_vm0, %v186_v53, 0.0  ;;  %v653_v53 = vlaneseq }
  0x1e   :  { %95 = vadd.xlane.f32.xlu2 %v94_v45  ;;  %92 = vadd.xlane.f32.xlu1 %v91_v46  ;;  %v155_v45 = vsel %vm60_vm0, %v119_v40, 0.0  ;;  %v210_v46 = vsel %vm60_vm0, %v180_v29, 0.0 }
  0x20   :  { %89 = vadd.xlane.f32.xlu0 %v88_v47  ;;  %v121_v47 = vmul.f32 %v1020_v52, %v1020_v52  ;;  %v122_v52 = vmul.f32 %v1010_v50, %v1010_v50  ;;  %v123_v50 = vmul.f32 %v1000_v48, %v1000_v48 }
  0x22   :  { %v161_v27 = vsel %vm60_vm0, %v121_v47, 0.0  ;;  %v167_v63 = vsel %vm60_vm0, %v123_v50, 0.0 }
  0x26   :  { %104 = vadd.xlane.f32.xlu2 %v103_v57  ;;  %101 = vadd.xlane.f32.xlu1 %v100_v58  ;;  %v164_v57 = vsel %vm60_vm0, %v122_v52, 0.0  ;;  %v219_v58 = vsel %vm60_vm0, %v183_v41, 0.0 }
  0x28   :  { %98 = vadd.xlane.f32.xlu0 %v97_v59  ;;  %v124_v59 = vmul.f32 %v1039_v60, %v1039_v60  ;;  %v187_v60 = vmul.f32 %v1005_v49, %v1005_v49 }
  0x2a   :  { %v170_v39 = vsel %vm60_vm0, %v124_v59, 0.0  ;;  %v231_v16 = vsel %vm60_vm0, %v187_v60, 0.0 }
  0x2e   :  { %129 = vadd.xlane.f32.xlu2 %v128_v7  ;;  %126 = vadd.xlane.f32.xlu1 %v125_v8 }
  0x30   :  { %107 = vadd.xlane.f32.xlu0 %v106_v12  ;;  %v234_v12 = vsel %vm60_vm0, %v188_v3, 0.0 }
  0x36   :  { %138 = vadd.xlane.f32.xlu2 %v137_v17  ;;  %135 = vadd.xlane.f32.xlu1 %v134_v18 }
  0x38   :  { %132 = vadd.xlane.f32.xlu0 %v131_v19 }
  0x3e   :  { %196 = vadd.xlane.f32.xlu2 %v195_v2  ;;  %193 = vadd.xlane.f32.xlu1 %v192_v21 }
  0x40   :  { %190 = vadd.xlane.f32.xlu0 %v189_v23 }
  0x46   :  { %144 = vadd.xlane.f32.xlu2 %v143_v6  ;;  %199 = vadd.xlane.f32.xlu1 %v198_v30 }
  0x48   :  { %141 = vadd.xlane.f32.xlu0 %v140_v31 }
  0x4e   :  { %205 = vadd.xlane.f32.xlu2 %v204_v9  ;;  %147 = vadd.xlane.f32.xlu1 %v146_v33 }
  0x50   :  { %202 = vadd.xlane.f32.xlu0 %v201_v34 }
  0x56   :  { %153 = vadd.xlane.f32.xlu2 %v152_v1  ;;  %208 = vadd.xlane.f32.xlu1 %v207_v42 }
  0x58   :  { %150 = vadd.xlane.f32.xlu0 %v149_v43 }
  0x5e   :  { %214 = vadd.xlane.f32.xlu2 %v213_v22  ;;  %156 = vadd.xlane.f32.xlu1 %v155_v45 }
  0x60   :  { %211 = vadd.xlane.f32.xlu0 %v210_v46 }
  0x66   :  { %162 = vadd.xlane.f32.xlu2 %v161_v27  ;;  %217 = vadd.xlane.f32.xlu1 %v216_v54 }
  0x68   :  { %159 = vadd.xlane.f32.xlu0 %v158_v55 }
  0x6e   :  { %223 = vadd.xlane.f32.xlu2 %v222_v36  ;;  %165 = vadd.xlane.f32.xlu1 %v164_v57 }
  0x70   :  { %220 = vadd.xlane.f32.xlu0 %v219_v58 }
  0x76   :  { %171 = vadd.xlane.f32.xlu2 %v170_v39  ;;  %226 = vadd.xlane.f32.xlu1 %v225_v62 }
  0x78   :  { %168 = vadd.xlane.f32.xlu0 %v167_v63 }
  0x79   :  { %v1142_v7 = vpop.xlane.xlu2 %74  ;;  %v1144_v48 = vpop.xlane.xlu1 %68 }
  0x7b   :  { %v1146_v8 = vpop.xlane.xlu0 %62 }
  0x7e   :  { %235 = vadd.xlane.f32.xlu2 %v234_v12  ;;  %232 = vadd.xlane.f32.xlu1 %v231_v16 }
  0x80   :  { %229 = vadd.xlane.f32.xlu0 %v228_v14 }
  0x81   :  { %v1151_v61 = vpop.xlane.xlu2 %77  ;;  %v1153_v49 = vpop.xlane.xlu1 %71 }
  0x83   :  { %v66_v51 = vpop.xlane.xlu0 %65 }
  0x89   :  { %v1155_v5 = vpop.xlane.xlu2 %86  ;;  %v1157_v17 = vpop.xlane.xlu1 %83 }
  0x8b   :  { %v1159_v18 = vpop.xlane.xlu0 %80 }
  0x91   :  { %v1161_v19 = vpop.xlane.xlu2 %95  ;;  %v1163_v20 = vpop.xlane.xlu1 %92 }
  0x93   :  { %v1165_v0 = vpop.xlane.xlu0 %89 }
  0x99   :  { %v1167_v11 = vpop.xlane.xlu2 %104  ;;  %v1169_v2 = vpop.xlane.xlu1 %101 }
  0x9b   :  { %v1171_v21 = vpop.xlane.xlu0 %98 }
  0xa1   :  { %v130_v23 = vpop.xlane.xlu2 %129  ;;  %v127_v4 = vpop.xlane.xlu1 %126 }
  0xa2   :  { %v238_v24 = vmax.f32 %v130_v23, 1e-24  ;;  %v237_v6 = vmax.f32 %v127_v4, 1e-24 }
  0xa3   :  { %v1173_v15 = vpop.xlane.xlu0 %107 }
  0xa4   :  { %735 = vrsqrt.f32 %v238_v24  ;;  %vm269_vm3 = vweird.f32 %v238_v24  ;;  %vm259_vm5 = vweird.f32 %v237_v6 }
  0xa5   :  { %737 = vrsqrt.f32 %v237_v6 }
  0xa9   :  { %v139_v30 = vpop.xlane.xlu2 %138  ;;  %v136_v32 = vpop.xlane.xlu1 %135 }
  0xaa   :  { %v736_v31 = vpop.eup %735  ;;  %v1175_v33 = vmax.f32 %v136_v32, 1e-24  ;;  %v1181_v29 = vmax.f32 %v139_v30, 1e-24  ;;  %v1219_v30 = vand.u32 127, %v653_v53 }
  0xab   :  { %v133_v28 = vpop.xlane.xlu0 %132  ;;  %v738_v13 = vpop.eup %737  ;;  %v264_v9 = vmul.f32 %v736_v31, %v238_v24  ;;  %vm270_vm1 = vweird.f32 %v736_v31 }
  0xac   :  { %v1177_v34 = vmax.f32 %v133_v28, 1e-24  ;;  %v254_v35 = vmul.f32 %v738_v13, %v237_v6  ;;  %739 = vrsqrt.f32 %v1175_v33  ;;  %vm260_vm2 = vweird.f32 %v738_v13  ;;  %vm271_vm4 = vmor %vm269_vm3, %vm270_vm1 }
  0xad   :  { %v265_v10 = vmul.f32 %v736_v31, %v264_v9  ;;  %vm261_vm6 = vmor %vm259_vm5, %vm260_vm2  ;;  %vm289_vm2 = vweird.f32 %v1175_v33 }
  0xae   :  { %v255_v26 = vmul.f32 %v738_v13, %v254_v35  ;;  %741 = vrsqrt.f32 %v1177_v34  ;;  %vm279_vm8 = vweird.f32 %v1177_v34 }
  0xaf   :  { %v266_v1 = vmul.f32 0.5, %v265_v10 }
  0xb0   :  { %v256_v42 = vmul.f32 0.5, %v255_v26 }
  0xb1   :  { %v267_v43 = vsub.f32 1.5, %v266_v1  ;;  %v197_v44 = vpop.xlane.xlu2 %196  ;;  %v194_v45 = vpop.xlane.xlu1 %193 }
  0xb2   :  { %v257_v40 = vsub.f32 1.5, %v256_v42  ;;  %v1183_v22 = vmax.f32 %v197_v44, 1e-24  ;;  %v1185_v47 = vpop.eup %739  ;;  %v1187_v38 = vmax.f32 %v194_v45, 1e-24 }
  0xb3   :  { %v191_v46 = vpop.xlane.xlu0 %190  ;;  %v268_v25 = vmul.f32 %v736_v31, %v267_v43  ;;  %v284_v57 = vmul.f32 %v1185_v47, %v1175_v33  ;;  %vm290_vm11 = vweird.f32 %v1185_v47  ;;  %v660_v33 = vadd.s32 4294967280, %v1219_v30 }
  0xb4   :  { %v1189_v27 = vpop.eup %741  ;;  %v258_v54 = vmul.f32 %v738_v13, %v257_v40  ;;  %743 = vrsqrt.f32 %v1183_v22  ;;  %v1205_v59 = vmax.f32 %v191_v46, 1e-24  ;;  %vm471_vm12 = vweird.f32 %v1183_v22  ;;  %vm1260_vm3 = vmor %vm289_vm2, %vm290_vm11 }
  0xb5   :  { %v272_v55 = vsel %vm271_vm4, %v736_v31, %v268_v25  ;;  %v274_v56 = vmul.f32 %v1189_v27, %v1177_v34  ;;  %745 = vrsqrt.f32 %v1181_v29  ;;  %v285_v3 = vmul.f32 %v1185_v47, %v284_v57 }
  0xb6   :  { %v1195_v52 = vmul.f32 %v272_v55, %v66_v51  ;;  %v262_v41 = vsel %vm261_vm6, %v738_v13, %v258_v54  ;;  %747 = vrsqrt.f32 %v1187_v38  ;;  %vm280_vm7 = vweird.f32 %v1189_v27 }
  0xb7   :  { %v1199_v36 = vmul.f32 %v262_v41, %v1146_v8  ;;  %v275_v58 = vmul.f32 %v1189_v27, %v274_v56  ;;  %749 = vrsqrt.f32 %v1205_v59  ;;  %v286_v6 = vmul.f32 0.5, %v285_v3  ;;  %vm1228_vm9 = vmor %vm279_vm8, %vm280_vm7 }
  0xb8   :  { %vm461_vm15 = vweird.f32 %v1187_v38  ;;  %vm451_vm4 = vweird.f32 %v1205_v59  ;;  %vm658_vm8 = vcmask 130112  }
  0xb9   :  { %v276_v37 = vmul.f32 0.5, %v275_v58  ;;  %v145_v50 = vpop.xlane.xlu2 %144  ;;  %v200_v62 = vpop.xlane.xlu1 %199  ;;  %v287_v40 = vsub.f32 1.5, %v286_v6 }
  0xba   :  { %v744_v39 = vpop.eup %743  ;;  %v1212_v16 = vmax.f32 %v200_v62, 1e-24  ;;  %v1234_v26 = vmax.f32 %v145_v50, 1e-24 }
  0xbb   :  { %v142_v63 = vpop.xlane.xlu0 %141  ;;  %v277_v60 = vsub.f32 1.5, %v276_v37  ;;  %v466_v8 = vmul.f32 %v744_v39, %v1183_v22  ;;  %v1210_v12 = vpop.eup %745  ;;  %vm472_vm10 = vweird.f32 %v744_v39  ;;  %v288_v62 = vmul.f32 %v1185_v47, %v287_v40 }
  0xbc   :  { %v748_v14 = vpop.eup %747  ;;  %v1214_v23 = vmax.f32 %v142_v63, 1e-24  ;;  %751 = vrsqrt.f32 %v1212_v16  ;;  %v294_v28 = vmul.f32 %v1210_v12, %v1181_v29  ;;  %vm473_vm13 = vmor %vm471_vm12, %vm472_vm10  ;;  %vm481_vm7 = vweird.f32 %v1212_v16 }
  0xbd   :  { %v467_v51 = vmul.f32 %v744_v39, %v466_v8  ;;  %v278_v24 = vmul.f32 %v1189_v27, %v277_v60  ;;  %v456_v4 = vmul.f32 %v748_v14, %v1187_v38  ;;  %v1222_v32 = vpop.eup %749  ;;  %vm462_vm14 = vweird.f32 %v748_v14 }
  0xbe   :  { %753 = vrsqrt.f32 %v1214_v23  ;;  %v446_v10 = vmul.f32 %v1222_v32, %v1205_v59  ;;  %v295_v54 = vmul.f32 %v1210_v12, %v294_v28  ;;  %vm463_vm0 = vmor %vm461_vm15, %vm462_vm14  ;;  %vm452_vm1 = vweird.f32 %v1222_v32 }
  0xbf   :  { %v468_v31 = vmul.f32 0.5, %v467_v51  ;;  %v457_v13 = vmul.f32 %v748_v14, %v456_v4  ;;  %v282_v34 = vsel %vm1228_vm9, %v1189_v27, %v278_v24  ;;  %vm453_vm5 = vmor %vm451_vm4, %vm452_vm1  ;;  %vm662_vm10 = vcmask 195712  }
  0xc0   :  { %v447_v46 = vmul.f32 %v1222_v32, %v446_v10  ;;  %v415_v56 = vmul.f32 %v282_v34, %v1144_v48  ;;  %v296_v48 = vmul.f32 0.5, %v295_v54  ;;  %vm300_vm11 = vweird.f32 %v1210_v12 }
  0xc1   :  { %v469_v35 = vsub.f32 1.5, %v468_v31  ;;  %v206_v1 = vpop.xlane.xlu2 %205  ;;  %v458_v42 = vmul.f32 0.5, %v457_v13  ;;  %v148_v44 = vpop.xlane.xlu1 %147  ;;  %vm299_vm12 = vweird.f32 %v1181_v29  ;;  %vm309_vm2 = vweird.f32 %v1214_v23 }
  0xc2   :  { %v1240_v43 = vmax.f32 %v206_v1, 1e-24  ;;  %v752_v27 = vpop.eup %751  ;;  %v448_v57 = vmul.f32 0.5, %v447_v46  ;;  %v297_v34 = vsub.f32 1.5, %v296_v48  ;;  %vm1300_vm14 = vmor %vm299_vm12, %vm300_vm11 }
  0xc3   :  { %v470_v45 = vmul.f32 %v744_v39, %v469_v35  ;;  %v203_v25 = vpop.xlane.xlu0 %202  ;;  %v459_v55 = vsub.f32 1.5, %v458_v42  ;;  %v476_v37 = vmul.f32 %v752_v27, %v1212_v16  ;;  %vm482_vm6 = vweird.f32 %v752_v27 }
  0xc4   :  { %755 = vrsqrt.f32 %v1240_v43  ;;  %v1249_v58 = vpop.eup %753  ;;  %v1253_v50 = vmax.f32 %v203_v25, 1e-24  ;;  %v449_v3 = vsub.f32 1.5, %v448_v57  ;;  %vm483_vm9 = vmor %vm481_vm7, %vm482_vm6  ;;  %v1288_v25 = vmax.f32 %v148_v44, 1e-24 }
  0xc5   :  { %v474_v41 = vsel %vm473_vm13, %v744_v39, %v470_v45  ;;  %757 = vrsqrt.f32 %v1234_v26  ;;  %v460_v22 = vmul.f32 %v748_v14, %v459_v55  ;;  %v477_v60 = vmul.f32 %v752_v27, %v476_v37 }
  0xc6   :  { %v607_v63 = vmul.f32 %v474_v41, %v415_v56  ;;  %v450_v8 = vmul.f32 %v1222_v32, %v449_v3  ;;  %v304_v51 = vmul.f32 %v1249_v58, %v1214_v23  ;;  %759 = vrsqrt.f32 %v1253_v50 }
  0xc7   :  { %v464_v39 = vsel %vm463_vm0, %v748_v14, %v460_v22  ;;  %v656_v14 = vadd.s32 4294967288, %v1219_v30  ;;  %v478_v6 = vmul.f32 0.5, %v477_v60  ;;  %v664_v57 = vadd.s32 4294967272, %v1219_v30 }
  0xc8   :  { %v606_v53 = vmul.f32 %v464_v39, %v1195_v52  ;;  %v292_v52 = vsel %vm1260_vm3, %v1185_v47, %v288_v62  ;;  %v623_v59 = vmul.f32 1000.0, %v607_v63  ;;  %v454_v13 = vsel %vm453_vm5, %v1222_v32, %v450_v8 }
  0xc9   :  { %v154_v24 = vpop.xlane.xlu2 %153  ;;  %v605_v9 = vmul.f32 %v454_v13, %v1199_v36  ;;  %v479_v35 = vsub.f32 1.5, %v478_v6  ;;  %v209_v1 = vpop.xlane.xlu1 %208  ;;  %v305_v42 = vmul.f32 %v1249_v58, %v304_v51  ;;  %v416_v32 = vmul.f32 %v292_v52, %v1153_v49 }
  0xca   :  { %v1269_v4 = vpop.eup %755  ;;  %v622_v28 = vmul.f32 1000.0, %v606_v53  ;;  %v661_v36 = vperm.slane %v623_v59, %v660_v33  ;;  %v298_v63 = vmul.f32 %v1210_v12, %v297_v34  ;;  %761 = vrsqrt.f32 %v1288_v25 }
  0xcb   :  { %v1274_v31 = vpop.eup %757  ;;  %v496_v10 = vmul.f32 %v1269_v4, %v1240_v43  ;;  %v621_v45 = vmul.f32 1000.0, %v605_v9  ;;  %v480_v46 = vmul.f32 %v752_v27, %v479_v35  ;;  %v151_v54 = vpop.xlane.xlu0 %150  ;;  %v306_v37 = vmul.f32 0.5, %v305_v42 }
  0xcc   :  { %v657_v40 = vperm.slane %v622_v28, %v656_v14  ;;  %v314_v47 = vmul.f32 %v1274_v31, %v1234_v26  ;;  %v760_v55 = vpop.eup %759  ;;  %vm666_vm13 = vcmask 261312   ;;  %v302_v33 = vsel %vm1300_vm14, %v1210_v12, %v298_v63 }
  0xcd   :  { %v655_v56 = vperm.slane %v621_v45, %v1219_v30  ;;  %v484_v16 = vsel %vm483_vm9, %v752_v27, %v480_v46  ;;  %v497_v41 = vmul.f32 %v1269_v4, %v496_v10  ;;  %v486_v62 = vmul.f32 %v760_v55, %v1253_v50 }
  0xce   :  { %v608_v22 = vmul.f32 %v484_v16, %v416_v32  ;;  %v315_v3 = vmul.f32 %v1274_v31, %v314_v47  ;;  %v307_v8 = vsub.f32 1.5, %v306_v37  ;;  %v1307_v6 = vmax.f32 %v209_v1, 1e-24 }
  0xcf   :  { %v659_v44 = vsel %vm658_vm8, %v657_v40, %v655_v56  ;;  %v487_v27 = vmul.f32 %v760_v55, %v486_v62  ;;  %v498_v60 = vmul.f32 0.5, %v497_v41  ;;  %v1309_v52 = vmax.f32 %v151_v54, 1e-24 }
  0xd0   :  { %v624_v48 = vmul.f32 1000.0, %v608_v22  ;;  %v663_v39 = vsel %vm662_vm10, %v661_v36, %v659_v44  ;;  %v316_v14 = vmul.f32 0.5, %v315_v3  ;;  %vm492_vm15 = vweird.f32 %v760_v55  ;;  %v1317_v10 = vpop.eup %761 }
  0xd1   :  { %v215_v49 = vpop.xlane.xlu2 %214  ;;  %v488_v51 = vmul.f32 0.5, %v487_v27  ;;  %v157_v59 = vpop.xlane.xlu1 %156  ;;  %v1311_v13 = vmax.f32 %v154_v24, 1e-24  ;;  %vm310_vm0 = vweird.f32 %v1249_v58  ;;  %v499_v9 = vsub.f32 1.5, %v498_v60 }
  0xd2   :  { %v665_v53 = vperm.slane %v624_v48, %v664_v57  ;;  %763 = vrsqrt.f32 %v1307_v6  ;;  %v1315_v35 = vmax.f32 %v215_v49, 1e-24  ;;  %v308_v12 = vmul.f32 %v1249_v58, %v307_v8  ;;  %vm1330_vm5 = vmor %vm309_vm2, %vm310_vm0 }
  0xd3   :  { %v489_v28 = vsub.f32 1.5, %v488_v51  ;;  %vm491_vm1 = vweird.f32 %v1253_v50  ;;  %765 = vrsqrt.f32 %v1309_v52  ;;  %v212_v34 = vpop.xlane.xlu0 %211  ;;  %v417_v24 = vmul.f32 %v302_v33, %v1142_v7 }
  0xd4   :  { %v667_v29 = vsel %vm666_vm13, %v665_v53, %v663_v39  ;;  %v668_v40 = vadd.s32 4294967264, %v1219_v30  ;;  %vm493_vm3 = vmor %vm491_vm1, %vm492_vm15  ;;  %v317_v45 = vsub.f32 1.5, %v316_v14  ;;  %vm502_vm4 = vweird.f32 %v1269_v4 }
  0xd5   :  { %v490_v1 = vmul.f32 %v760_v55, %v489_v28  ;;  %767 = vrsqrt.f32 %v1311_v13  ;;  %v500_v7 = vmul.f32 %v1269_v4, %v499_v9  ;;  %v324_v23 = vmul.f32 %v1317_v10, %v1288_v25 }
  0xd6   :  { %769 = vrsqrt.f32 %v1315_v35  ;;  %v312_v32 = vsel %vm1330_vm5, %v1249_v58, %v308_v12  ;;  %v1341_v36 = vmax.f32 %v157_v59, 1e-24  ;;  %v1343_v54 = vmax.f32 %v212_v34, 1e-24 }
  0xd7   :  { %v494_v47 = vsel %vm493_vm3, %v760_v55, %v490_v1  ;;  %vm501_vm6 = vweird.f32 %v1240_v43  ;;  %vm670_vm7 = vcmask 326912   ;;  %v318_v41 = vmul.f32 %v1274_v31, %v317_v45 }
  0xd8   :  { %v609_v46 = vmul.f32 %v494_v47, %v417_v24  ;;  %v764_v55 = vpop.eup %763  ;;  %vm320_vm8 = vweird.f32 %v1274_v31  ;;  %vm1352_vm9 = vmor %vm501_vm6, %vm502_vm4  ;;  %771 = vrsqrt.f32 %v1343_v54  ;;  %v418_v43 = vmul.f32 %v312_v32, %v1151_v61 }
  0xd9   :  { %v163_v42 = vpop.xlane.xlu2 %162  ;;  %v1346_v16 = vpop.eup %765  ;;  %v506_v58 = vmul.f32 %v764_v55, %v1307_v6  ;;  %v504_v22 = vsel %vm1352_vm9, %v1269_v4, %v500_v7  ;;  %v325_v37 = vmul.f32 %v1317_v10, %v324_v23  ;;  %773 = vrsqrt.f32 %v1341_v36 }
  0xda   :  { %v625_v56 = vmul.f32 1000.0, %v609_v46  ;;  %v218_v49 = vpop.xlane.xlu1 %217  ;;  %v334_v3 = vmul.f32 %v1346_v16, %v1309_v52  ;;  %v1368_v48 = vmax.f32 %v163_v42, 1e-24  ;;  %vm319_vm10 = vweird.f32 %v1234_v26 }
  0xdb   :  { %v1363_v63 = vpop.eup %767  ;;  %v507_v44 = vmul.f32 %v764_v55, %v506_v58  ;;  %vm1376_vm11 = vmor %vm319_vm10, %vm320_vm8  ;;  %v610_v27 = vmul.f32 %v504_v22, %v418_v43  ;;  %v160_v38 = vpop.xlane.xlu0 %159  ;;  %v326_v51 = vmul.f32 0.5, %v325_v37  ;;  %vm512_vm12 = vweird.f32 %v764_v55 }
  0xdc   :  { %v669_v62 = vperm.slane %v625_v56, %v668_v40  ;;  %v1370_v39 = vpop.eup %769  ;;  %v322_v8 = vsel %vm1376_vm11, %v1274_v31, %v318_v41  ;;  %v344_v26 = vmul.f32 %v1363_v63, %v1311_v13  ;;  %v335_v59 = vmul.f32 %v1346_v16, %v334_v3 }
  0xdd   :  { %v508_v60 = vmul.f32 0.5, %v507_v44  ;;  %775 = vrsqrt.f32 %v1368_v48  ;;  %v1393_v9 = vmax.f32 %v218_v49, 1e-24  ;;  %v672_v12 = vadd.s32 4294967256, %v1219_v30 }
  0xde   :  { %v671_v61 = vsel %vm670_vm7, %v669_v62, %v667_v29  ;;  %v1385_v33 = vpop.eup %771  ;;  %v526_v29 = vmul.f32 %v1370_v39, %v1315_v35  ;;  %v626_v1 = vmul.f32 1000.0, %v610_v27  ;;  %vm511_vm13 = vweird.f32 %v1307_v6 }
  0xdf   :  { %v509_v14 = vsub.f32 1.5, %v508_v60  ;;  %v516_v28 = vmul.f32 %v1385_v33, %v1343_v54  ;;  %v1395_v31 = vpop.eup %773  ;;  %v419_v42 = vmul.f32 %v322_v8, %v1159_v18  ;;  %v327_v24 = vsub.f32 1.5, %v326_v51  ;;  %vm513_vm14 = vmor %vm511_vm13, %vm512_vm12 }
  0xe0   :  { %v676_v40 = vadd.s32 4294967248, %v1219_v30  ;;  %v345_v45 = vmul.f32 %v1363_v63, %v344_v26  ;;  %v336_v50 = vmul.f32 0.5, %v335_v59  ;;  %v527_v7 = vmul.f32 %v1370_v39, %v526_v29 }
  0xe1   :  { %v224_v53 = vpop.xlane.xlu2 %223  ;;  %v510_v34 = vmul.f32 %v764_v55, %v509_v14  ;;  %v354_v46 = vmul.f32 %v1395_v31, %v1341_v36  ;;  %v517_v32 = vmul.f32 %v1385_v33, %v516_v28  ;;  %777 = vrsqrt.f32 %v1393_v9 }
  0xe2   :  { %v166_v18 = vpop.xlane.xlu1 %165  ;;  %v673_v56 = vperm.slane %v626_v1, %v672_v12  ;;  %v1410_v41 = vmax.f32 %v160_v38, 1e-24  ;;  %vm330_vm15 = vweird.f32 %v1317_v10  ;;  %vm674_vm0 = vcmask 392512  }
  0xe3   :  { %v514_v47 = vsel %vm513_vm14, %v764_v55, %v510_v34  ;;  %v1408_v6 = vpop.eup %775  ;;  %vm678_vm1 = vcmask 458112   ;;  %v328_v57 = vmul.f32 %v1317_v10, %v327_v24  ;;  %v346_v58 = vmul.f32 0.5, %v345_v45  ;;  %v221_v37 = vpop.xlane.xlu0 %220 }
  0xe4   :  { %v611_v23 = vmul.f32 %v514_v47, %v419_v42  ;;  %v337_v43 = vsub.f32 1.5, %v336_v50  ;;  %v528_v22 = vmul.f32 0.5, %v527_v7  ;;  %v355_v44 = vmul.f32 %v1395_v31, %v354_v46 }
  0xe5   :  { %v518_v3 = vmul.f32 0.5, %v517_v32  ;;  %v374_v4 = vmul.f32 %v1408_v6, %v1368_v48  ;;  %vm329_vm2 = vweird.f32 %v1288_v25  ;;  %v675_v27 = vsel %vm674_vm0, %v673_v56, %v671_v61 }
  0xe6   :  { %v627_v55 = vmul.f32 1000.0, %v611_v23  ;;  %779 = vrsqrt.f32 %v1410_v41  ;;  %v1419_v60 = vmax.f32 %v224_v53, 1e-24  ;;  %vm1425_vm3 = vmor %vm329_vm2, %vm330_vm15  ;;  %vm349_vm4 = vweird.f32 %v1311_v13 }
  0xe7   :  { %v1421_v38 = vpop.eup %777  ;;  %v1434_v25 = vadd.s32 4294967232, %v1219_v30  ;;  %v332_v61 = vsel %vm1425_vm3, %v1317_v10, %v328_v57  ;;  %v347_v53 = vsub.f32 1.5, %v346_v58  ;;  %vm340_vm5 = vweird.f32 %v1346_v16 }
  0xe8   :  { %v677_v49 = vperm.slane %v627_v55, %v676_v40  ;;  %v529_v26 = vsub.f32 1.5, %v528_v22  ;;  %v338_v14 = vmul.f32 %v1346_v16, %v337_v43  ;;  %v356_v59 = vmul.f32 0.5, %v355_v44 }
  0xe9   :  { %v172_v62 = vpop.xlane.xlu2 %171  ;;  %v519_v29 = vsub.f32 1.5, %v518_v3  ;;  %v375_v28 = vmul.f32 %v1408_v6, %v374_v4  ;;  %v536_v12 = vmul.f32 %v1421_v38, %v1393_v9  ;;  %781 = vrsqrt.f32 %v1419_v60 }
  0xea   :  { %v1431_v51 = vsel %vm678_vm1, %v677_v49, %v675_v27  ;;  %v1445_v1 = vmax.f32 %v166_v18, 1e-24  ;;  %v1447_v34 = vmax.f32 %v221_v37, 1e-24  ;;  %v420_v10 = vmul.f32 %v332_v61, %v1157_v17  ;;  %v227_v42 = vpop.xlane.xlu1 %226 }
  0xeb   :  { %vm350_vm6 = vweird.f32 %v1363_v63  ;;  %vm339_vm7 = vweird.f32 %v1309_v52  ;;  %vm532_vm8 = vweird.f32 %v1370_v39  ;;  %v348_v40 = vmul.f32 %v1363_v63, %v347_v53  ;;  %v169_v18 = vpop.xlane.xlu0 %168 }
  0xec   :  { %v1453_v24 = vpop.eup %779  ;;  %vm1458_vm9 = vmor %vm339_vm7, %vm340_vm5  ;;  %v530_v47 = vmul.f32 %v1370_v39, %v529_v26  ;;  %vm522_vm10 = vweird.f32 %v1385_v33  ;;  %783 = vrsqrt.f32 %v1447_v34  ;;  %v357_v52 = vsub.f32 1.5, %v356_v59 }
  0xed   :  { %v342_v17 = vsel %vm1458_vm9, %v1346_v16, %v338_v14  ;;  %v376_v50 = vmul.f32 0.5, %v375_v28  ;;  %v1468_v7 = vmax.f32 %v172_v62, 1e-24  ;;  %v520_v23 = vmul.f32 %v1385_v33, %v519_v29  ;;  %vm1479_vm11 = vmor %vm349_vm4, %vm350_vm6 }
  0xee   :  { %v537_v46 = vmul.f32 %v1421_v38, %v536_v12  ;;  %785 = vrsqrt.f32 %v1445_v1  ;;  %v1473_v32 = vmax.f32 %v227_v42, 1e-24  ;;  %vm531_vm12 = vweird.f32 %v1315_v35 }
  0xef   :  { %vm359_vm13 = vweird.f32 %v1341_v36  ;;  %v364_v55 = vmul.f32 %v1453_v24, %v1410_v41  ;;  %787 = vrsqrt.f32 %v1468_v7  ;;  %v1488_v57 = vpop.eup %781  ;;  %v352_v58 = vsel %vm1479_vm11, %v1363_v63, %v348_v40  ;;  %vm1495_vm14 = vmor %vm531_vm12, %vm532_vm8 }
  0xf0   :  { %vm360_vm15 = vweird.f32 %v1395_v31  ;;  %vm521_vm0 = vweird.f32 %v1343_v54  ;;  %789 = vrsqrt.f32 %v1473_v32  ;;  %v421_v35 = vmul.f32 %v342_v17, %v1155_v5 }
  0xf1   :  { %v236_v56 = vpop.xlane.xlu2 %235  ;;  %v534_v43 = vsel %vm1495_vm14, %v1370_v39, %v530_v47  ;;  %vm1508_vm1 = vmor %vm521_vm0, %vm522_vm10  ;;  %v1512_v22 = vmax.f32 %v169_v18, 1e-24  ;;  %v358_v54 = vmul.f32 %v1395_v31, %v357_v52  ;;  %v377_v49 = vsub.f32 1.5, %v376_v50 }
  0xf2   :  { %v1514_v37 = vmax.f32 %v236_v56, 1e-24  ;;  %v1516_v62 = vpop.eup %783  ;;  %v524_v5 = vsel %vm1508_vm1, %v1385_v33, %v520_v23  ;;  %v538_v39 = vmul.f32 0.5, %v537_v46  ;;  %v365_v44 = vmul.f32 %v1453_v24, %v364_v55  ;;  %vm1546_vm3 = vmor %vm359_vm13, %vm360_vm15  ;;  %v233_v59 = vpop.xlane.xlu1 %232 }
  0xf3   :  { %v556_v3 = vmul.f32 %v1488_v57, %v1419_v60  ;;  %v546_v4 = vmul.f32 %v1516_v62, %v1447_v34  ;;  %791 = vrsqrt.f32 %v1512_v22  ;;  %v1531_v8 = vmul.f32 %v352_v58, %v1165_v0 }
  0xf4   :  { %v1528_v27 = vpop.eup %785  ;;  %v1534_v61 = vadd.s32 4294967240, %v1219_v30  ;;  %vm379_vm2 = vweird.f32 %v1368_v48  ;;  %v1538_v33 = vadd.s32 4294967224, %v1219_v30  ;;  %v613_v26 = vmul.f32 %v534_v43, %v421_v35 }
  0xf5   :  { %v1540_v53 = vpop.eup %787  ;;  %vm380_vm4 = vweird.f32 %v1408_v6  ;;  %vm541_vm5 = vweird.f32 %v1393_v9  ;;  %v547_v0 = vmul.f32 %v1516_v62, %v546_v4  ;;  %793 = vrsqrt.f32 %v1514_v37 }
  0xf6   :  { %v1554_v29 = vpop.eup %789  ;;  %v362_v28 = vsel %vm1546_vm3, %v1395_v31, %v358_v54  ;;  %v612_v36 = vmul.f32 %v524_v5, %v420_v10  ;;  %v378_v12 = vmul.f32 %v1408_v6, %v377_v49  ;;  %v539_v42 = vsub.f32 1.5, %v538_v39  ;;  %vm1583_vm6 = vmor %vm379_vm2, %vm380_vm4  ;;  %v230_v39 = vpop.xlane.xlu0 %229 }
  0xf7   :  { %v366_v40 = vmul.f32 0.5, %v365_v44  ;;  %v557_v45 = vmul.f32 %v1488_v57, %v556_v3  ;;  %v384_v47 = vmul.f32 %v1528_v27, %v1445_v1  ;;  %v566_v17 = vmul.f32 %v1554_v29, %v1473_v32 }
  0xf8   :  { %v1566_v52 = vadd.s32 4294967208, %v1219_v30  ;;  %v548_v50 = vmul.f32 0.5, %v547_v0  ;;  %v404_v31 = vmul.f32 %v1540_v53, %v1468_v7  ;;  %v1570_v10 = vmax.f32 %v233_v59, 1e-24 }
  0xf9   :  { %v1572_v23 = vpop.eup %791  ;;  %v1574_v46 = vmul.f32 1000.0, %v613_v26  ;;  %v1577_v18 = vmul.f32 %v362_v28, %v1163_v20  ;;  %vm542_vm7 = vweird.f32 %v1421_v38  ;;  %vm369_vm8 = vweird.f32 %v1410_v41 }
  0xfa   :  { %v567_v16 = vmul.f32 %v1554_v29, %v566_v17  ;;  %v1590_v55 = vmul.f32 1000.0, %v612_v36  ;;  %v382_v20 = vsel %vm1583_vm6, %v1408_v6, %v378_v12  ;;  %v540_v58 = vmul.f32 %v1421_v38, %v539_v42  ;;  %vm1620_vm11 = vmor %vm541_vm5, %vm542_vm7 }
  0xfb   :  { %v394_v48 = vmul.f32 %v1572_v23, %v1512_v22  ;;  %v1598_v13 = vpop.eup %793  ;;  %v367_v35 = vsub.f32 1.5, %v366_v40  ;;  %v558_v43 = vmul.f32 0.5, %v557_v45  ;;  %v385_v63 = vmul.f32 %v1528_v27, %v384_v47 }
  0xfc   :  { %795 = vrsqrt.f32 %v1570_v10  ;;  %v549_v54 = vsub.f32 1.5, %v548_v50  ;;  %v405_v5 = vmul.f32 %v1540_v53, %v404_v31  ;;  %v596_v6 = vmul.f32 %v1598_v13, %v1514_v37 }
  0xfd   :  { %v395_v49 = vmul.f32 %v1572_v23, %v394_v48  ;;  %vm370_vm9 = vweird.f32 %v1453_v24  ;;  %vm561_vm10 = vweird.f32 %v1419_v60  ;;  %v1609_v44 = vadd.s32 4294967216, %v1219_v30 }
  0xfe   :  { %v568_v3 = vmul.f32 0.5, %v567_v16  ;;  %v681_v4 = vperm.slane %v1590_v55, %v1534_v61  ;;  %v1614_v26 = vmul.f32 %v382_v20, %v1171_v21  ;;  %v597_v59 = vmul.f32 %v1598_v13, %v596_v6  ;;  %vm1643_vm15 = vmor %vm369_vm8, %vm370_vm9 }
  0xff   :  { %v396_v0 = vmul.f32 0.5, %v395_v49  ;;  %v544_v28 = vsel %vm1620_vm11, %v1421_v38, %v540_v58  ;;  %v368_v36 = vmul.f32 %v1453_v24, %v367_v35  ;;  %v559_v12 = vsub.f32 1.5, %v558_v43 }
 0x100   :  { %v1629_v21 = vmax.f32 %v230_v39, 1e-24  ;;  %v386_v42 = vmul.f32 0.5, %v385_v63  ;;  %v550_v40 = vmul.f32 %v1516_v62, %v549_v54  ;;  %vm552_vm12 = vweird.f32 %v1516_v62 }
 0x101   :  { %v406_v9 = vmul.f32 0.5, %v405_v5  ;;  %vm389_vm13 = vweird.f32 %v1445_v1  ;;  %vm551_vm14 = vweird.f32 %v1447_v34  ;;  %v569_v47 = vsub.f32 1.5, %v568_v3 }
 0x102   :  { %v1633_v45 = vpop.eup %795  ;;  %v397_v17 = vsub.f32 1.5, %v396_v0  ;;  %797 = vrsqrt.f32 %v1629_v21  ;;  %v614_v38 = vmul.f32 %v544_v28, %v1531_v8  ;;  %vm562_vm0 = vweird.f32 %v1488_v57  ;;  %vm1655_vm2 = vmor %vm551_vm14, %vm552_vm12 }
 0x103   :  { %vm409_vm1 = vweird.f32 %v1468_v7  ;;  %v598_v31 = vmul.f32 0.5, %v597_v59  ;;  %v372_v34 = vsel %vm1643_vm15, %v1453_v24, %v368_v36  ;;  %v560_v56 = vmul.f32 %v1488_v57, %v559_v12  ;;  %vm1677_vm7 = vmor %vm561_vm10, %vm562_vm0 }
 0x104   :  { %vm571_vm3 = vweird.f32 %v1473_v32  ;;  %v586_v41 = vmul.f32 %v1633_v45, %v1570_v10  ;;  %vm682_vm4 = vcmask 523712   ;;  %v387_v16 = vsub.f32 1.5, %v386_v42 }
 0x105   :  { %v554_v20 = vsel %vm1655_vm2, %v1516_v62, %v550_v40  ;;  %v407_v24 = vsub.f32 1.5, %v406_v9  ;;  %vm572_vm5 = vweird.f32 %v1554_v29  ;;  %v570_v58 = vmul.f32 %v1554_v29, %v569_v47 }
 0x106   :  { %v398_v48 = vmul.f32 %v1572_v23, %v397_v17  ;;  %vm400_vm6 = vweird.f32 %v1572_v23  ;;  %v587_v35 = vmul.f32 %v1633_v45, %v586_v41  ;;  %v1670_v43 = vmul.f32 1000.0, %v614_v38  ;;  %vm1686_vm12 = vmor %vm571_vm3, %vm572_vm5 }
 0x107   :  { %v424_v63 = vmul.f32 %v372_v34, %v1161_v19  ;;  %vm390_vm8 = vweird.f32 %v1528_v27  ;;  %v599_v54 = vsub.f32 1.5, %v598_v31  ;;  %vm686_vm9 = vcmask 589312  }
 0x108   :  { %v798_v5 = vpop.eup %797  ;;  %v615_v49 = vmul.f32 %v554_v20, %v1577_v18  ;;  %vm410_vm11 = vweird.f32 %v1540_v53  ;;  %vm399_vm10 = vweird.f32 %v1512_v22  ;;  %v588_v60 = vmul.f32 0.5, %v587_v35  ;;  %vm1714_vm2 = vmor %vm389_vm13, %vm390_vm8 }
 0x109   :  { %vm690_vm14 = vcmask 654912   ;;  %v564_v6 = vsel %vm1677_vm7, %v1488_v57, %v560_v56  ;;  %v388_v39 = vmul.f32 %v1528_v27, %v387_v16  ;;  %v408_v18 = vmul.f32 %v1540_v53, %v407_v24  ;;  %vm1698_vm15 = vmor %vm399_vm10, %vm400_vm6 }
 0x10a   :  { %v576_v3 = vmul.f32 %v798_v5, %v1629_v21  ;;  %v574_v22 = vsel %vm1686_vm12, %v1554_v29, %v570_v58  ;;  %v402_v57 = vsel %vm1698_vm15, %v1572_v23, %v398_v48  ;;  %v589_v14 = vsub.f32 1.5, %v588_v60  ;;  %vm1725_vm6 = vmor %vm409_vm1, %vm410_vm11 }
 0x10b   :  { %vm592_vm0 = vweird.f32 %v1633_v45  ;;  %v600_v59 = vmul.f32 %v1598_v13, %v599_v54  ;;  %vm601_vm3 = vweird.f32 %v1514_v37  ;;  %vm602_vm5 = vweird.f32 %v1598_v13 }
 0x10c   :  { %v577_v29 = vmul.f32 %v798_v5, %v576_v3  ;;  %v616_v28 = vmul.f32 %v564_v6, %v424_v63  ;;  %v631_v23 = vmul.f32 1000.0, %v615_v49  ;;  %v590_v1 = vmul.f32 %v1633_v45, %v589_v14  ;;  %vm603_vm1 = vmor %vm601_vm3, %vm602_vm5 }
 0x10d   :  { %vm591_vm13 = vweird.f32 %v1570_v10  ;;  %v412_v12 = vsel %vm1725_vm6, %v1540_v53, %v408_v18  ;;  %v617_v42 = vmul.f32 %v574_v22, %v1614_v26  ;;  %v427_v40 = vmul.f32 %v402_v57, %v1167_v11 }
 0x10e   :  { %vm593_vm7 = vmor %vm591_vm13, %vm592_vm0  ;;  %v578_v9 = vmul.f32 0.5, %v577_v29  ;;  %v685_v7 = vperm.slane %v1574_v46, %v1434_v25  ;;  %v392_v47 = vsel %vm1714_vm2, %v1528_v27, %v388_v39  ;;  %v700_v17 = vadd.s32 4294967200, %v1219_v30 }
 0x10f   :  { %v594_v53 = vsel %vm593_vm7, %v1633_v45, %v590_v1  ;;  %v604_v11 = vsel %vm603_vm1, %v1598_v13, %v600_v59  ;;  %vm582_vm8 = vweird.f32 %v798_v5  ;;  %v683_v25 = vsel %vm682_vm4, %v681_v4, %v1431_v51 }
 0x110   :  { %v619_v10 = vmul.f32 %v594_v53, %v427_v40  ;;  %v579_v26 = vsub.f32 1.5, %v578_v9  ;;  %v689_v27 = vperm.slane %v1670_v43, %v1538_v33  ;;  %v632_v46 = vmul.f32 1000.0, %v616_v28 }
 0x111   :  { %v428_v37 = vmul.f32 %v412_v12, %v1173_v15  ;;  %v693_v38 = vperm.slane %v631_v23, %v1609_v44  ;;  %v633_v45 = vmul.f32 1000.0, %v617_v42  ;;  %vm581_vm11 = vweird.f32 %v1629_v21 }
 0x112   :  { %v580_v50 = vmul.f32 %v798_v5, %v579_v26  ;;  %v426_v13 = vmul.f32 %v392_v47, %v1169_v2  ;;  %vm583_vm12 = vmor %vm581_vm11, %vm582_vm8  ;;  %vm694_vm10 = vcmask 720512   ;;  %v687_v61 = vsel %vm686_vm9, %v685_v7, %v683_v25 }
 0x113   :  { %v620_v31 = vmul.f32 %v604_v11, %v428_v37  ;;  %v635_v51 = vmul.f32 1000.0, %v619_v10  ;;  %v708_v33 = vadd.s32 4294967184, %v1219_v30  ;;  %v691_v4 = vsel %vm690_vm14, %v689_v27, %v687_v61 }
 0x114   :  { %v584_v55 = vsel %vm583_vm12, %v798_v5, %v580_v50  ;;  %v697_v15 = vperm.slane %v632_v46, %v1566_v52  ;;  %v704_v44 = vadd.s32 4294967192, %v1219_v30  ;;  %v701_v56 = vperm.slane %v633_v45, %v700_v17 }
 0x115   :  { %v618_v34 = vmul.f32 %v584_v55, %v426_v13  ;;  %v695_v21 = vsel %vm694_vm10, %v693_v38, %v691_v4  ;;  %vm698_vm4 = vcmask 786112   ;;  %v636_v2 = vmul.f32 1000.0, %v620_v31 }
 0x116   :  { %vm702_vm15 = vcmask 851712   ;;  %v712_v41 = vadd.s32 4294967176, %v1219_v30  ;;  %vm706_vm9 = vcmask 917312   ;;  %v709_v16 = vperm.slane %v635_v51, %v708_v33 }
 0x117   :  { %v634_v8 = vmul.f32 1000.0, %v618_v34  ;;  %v699_v24 = vsel %vm698_vm4, %v697_v15, %v695_v21  ;;  %vm710_vm0 = vcmask 982912   ;;  %vm714_vm14 = vcmask 1048512  }
 0x118   :  { %v703_v52 = vsel %vm702_vm15, %v701_v56, %v699_v24  ;;  %v713_v48 = vperm.slane %v636_v2, %v712_v41 }
 0x119   :  { %v705_v20 = vperm.slane %v634_v8, %v704_v44 }
 0x11b   :  { %v707_v58 = vsel %vm706_vm9, %v705_v20, %v703_v52 }
 0x11c   :  { %v711_v35 = vsel %vm710_vm0, %v709_v16, %v707_v58 }
 0x11d   :  { %v715_v43 = vsel %vm714_vm14, %v713_v48, %v711_v35 }
 0x11e   :  { %717 = vst [vmem:[#allocation2] sm:$0x1] %v715_v43 }
 0x11f   :  { %728 = dma.vmem_to_hbm [thread:$0]  %s724_s1, 16, %s726_s19, [#allocation3]  }
 0x120   :  { %823 = dma.done.wait [#allocation3], 16  }
 0x121   :  { %824 = vsyncadd [#allocation3], 4294967280 }
 0x122   :  { %733 = vsyncpa [#allocation3], 1 }

</bundles_post_ra>
